<compile_context>
chip_gen: v7x
topology: tpu7x:2x2x1
jax: 0.10.0
libtpu: 0.0.40
codegen_flags: <defaults>
</compile_context>

<pallas_src>
import jax
import jax.numpy as jnp
from jax import lax
from jax.experimental import pallas as pl
from jax.experimental.pallas import tpu as pltpu


def _round_up(n, m):
    return ((n + m - 1) // m) * m


def _cosine_kernel(x_ref, w_ref, inv_w_ref, out_ref, acc_ref, ssq_ref):
    # x_ref:     VMEM [TM, TK]   raw input tile
    # w_ref:     VMEM [TK, TN]   raw weight tile
    # inv_w_ref: VMEM [1,  TN]   scale / max(||w_col||, 1e-12)   (precomputed)
    # out_ref:   VMEM [TM, TN]
    # acc_ref:   VMEM [TM, TN]   f32 matmul accumulator (resident across k)
    # ssq_ref:   VMEM [TM, 1]    f32 row sum-of-squares of x (resident across k)
    k = pl.program_id(2)

    @pl.when(k == 0)
    def _():
        acc_ref[...] = jnp.zeros_like(acc_ref)
        ssq_ref[...] = jnp.zeros_like(ssq_ref)

    x = x_ref[...]
    acc_ref[...] += jnp.dot(x, w_ref[...], preferred_element_type=jnp.float32)
    xf = x.astype(jnp.float32)
    ssq_ref[...] += jnp.sum(xf * xf, axis=-1, keepdims=True)

    @pl.when(k == pl.num_programs(2) - 1)
    def _():
        # 1 / max(||x_i||, 1e-12) == rsqrt(max(sum(x_i^2), 1e-24))  (EUP op)
        inv_x = lax.rsqrt(jnp.maximum(ssq_ref[...], 1e-24))
        out_ref[...] = (inv_x * acc_ref[...] * inv_w_ref[...]).astype(out_ref.dtype)


def cosine_classifier(x, weight, scale, *, tm=256, tn=512, tk=512,
                      matmul_dtype=None):
    """x: [B, n_feat], weight: [n_feat, num_classes], scale: scalar.

    tm/tn/tk are upper bounds on tile sizes; they are clamped to the (padded)
    problem size.  For v5e prefer tn=tk=128; for v7x halve tk relative to v6e.
    matmul_dtype=jnp.bfloat16 streams bf16 operands (f32 accumulation kept).
    """
    B, K = x.shape
    Kw, N = weight.shape
    assert K == Kw, (K, Kw)

    # Hoisted (per-call, weight-reuse friendly) per-class inverse L2 norm with
    # the learned scale folded in -> single fused multiply in the epilogue.
    w_f32 = weight.astype(jnp.float32)
    col_norm = jnp.sqrt(jnp.sum(w_f32 * w_f32, axis=0, keepdims=True))  # [1, N]
    inv_w = jnp.asarray(scale, jnp.float32) / jnp.maximum(col_norm, 1e-12)

    if matmul_dtype is not None:
        x = x.astype(matmul_dtype)
        weight = weight.astype(matmul_dtype)

    # Clamp tiles: sublane dims to multiples of 8, lane dims to multiples of 128.
    tm = min(tm, _round_up(B, 8))
    tk = min(tk, _round_up(K, 128))
    tn = min(tn, _round_up(N, 128))

    Bp, Kp, Np = _round_up(B, tm), _round_up(K, tk), _round_up(N, tn)

    if (Bp, Kp) != (B, K):
        x = jnp.pad(x, ((0, Bp - B), (0, Kp - K)))
    if (Kp, Np) != (K, N):
        weight = jnp.pad(weight, ((0, Kp - K), (0, Np - N)))
    if Np != N:
        inv_w = jnp.pad(inv_w, ((0, 0), (0, Np - N)))

    grid = (Bp // tm, Np // tn, Kp // tk)

    out = pl.pallas_call(
        _cosine_kernel,
        out_shape=jax.ShapeDtypeStruct((Bp, Np), jnp.float32),
        grid_spec=pltpu.PrefetchScalarGridSpec(
            num_scalar_prefetch=0,
            grid=grid,
            in_specs=[
                pl.BlockSpec((tm, tk), lambda i, j, k: (i, k)),   # x
                pl.BlockSpec((tk, tn), lambda i, j, k: (k, j)),   # weight
                pl.BlockSpec((1, tn), lambda i, j, k: (0, j)),    # scale/||w_j||
            ],
            out_specs=pl.BlockSpec((tm, tn), lambda i, j, k: (i, j)),
            scratch_shapes=[
                pltpu.VMEM((tm, tn), jnp.float32),   # acc
                pltpu.VMEM((tm, 1), jnp.float32),    # row sum-of-squares
            ],
        ),
        compiler_params=pltpu.CompilerParams(
            dimension_semantics=("parallel", "parallel", "arbitrary")),
    )(x, weight, inv_w)

    return out[:B, :N]


def _reference(x, weight, scale):
    x_n = x / jnp.maximum(jnp.linalg.norm(x, axis=-1, keepdims=True), 1e-12)
    w_n = weight / jnp.maximum(jnp.linalg.norm(weight, axis=0, keepdims=True), 1e-12)
    return scale * (x_n @ w_n)


if __name__ == "__main__":
    key = jax.random.PRNGKey(0)
    k_x, k_w, k_x2, k_w2 = jax.random.split(key, 4)

    # --- Small config matching the PyTorch module's toy shapes -------------
    B, n_feat, num_classes = 8, 32, 16
    weight = (jax.random.normal(k_w, (n_feat, num_classes), dtype=jnp.float32)
              * jnp.sqrt(2.0 / num_classes))
    scale = jnp.float32(10.0)
    x = jax.random.normal(k_x, (B, n_feat), dtype=jnp.float32)

    out = jax.block_until_ready(cosine_classifier(x, weight, scale))
    ref = _reference(x, weight, scale)
    assert out.shape == (B, num_classes)
    assert jnp.allclose(out, ref, atol=1e-3, rtol=1e-3), "mismatch vs reference (small)"

    # --- Slightly larger config to exercise the multi-step K accumulation --
    B2, n_feat2, num_classes2 = 24, 384, 256
    weight2 = (jax.random.normal(k_w2, (n_feat2, num_classes2), dtype=jnp.float32)
               * jnp.sqrt(2.0 / num_classes2))
    x2 = jax.random.normal(k_x2, (B2, n_feat2), dtype=jnp.float32)

    out2 = jax.block_until_ready(
        cosine_classifier(x2, weight2, scale, tk=128))   # grid K axis = 3 steps
    ref2 = _reference(x2, weight2, scale)
    assert out2.shape == (B2, num_classes2)
    assert jnp.allclose(out2, ref2, atol=1e-3, rtol=1e-3), "mismatch vs reference (tiled K)"

    print("KERNEL_OK")
</pallas_src>

<mosaic_0001>
module attributes {stable_mosaic.version = 11 : i64} {
  func.func @_cosine_kernel(%arg0: i32, %arg1: i32, %arg2: i32, %arg3: memref<8x128xf32, #tpu.memory_space<vmem>>, %arg4: memref<128x128xf32, #tpu.memory_space<vmem>>, %arg5: memref<1x128xf32, #tpu.memory_space<vmem>>, %arg6: memref<8x128xf32, #tpu.memory_space<vmem>>, %arg7: memref<8x128xf32, #tpu.memory_space<vmem>>, %arg8: memref<8x1xf32, #tpu.memory_space<vmem>>) attributes {dimension_semantics = [#tpu.dimension_semantics<parallel>, #tpu.dimension_semantics<parallel>, #tpu.dimension_semantics<arbitrary>], iteration_bounds = array<i64: 1, 1, 1>, scalar_prefetch = 0 : i64, scratch_operands = 2 : i64, tpu.core_type = #tpu.core_type<tc>, window_params = [{transform_indices = @transform_0, window_bounds = array<i64: 8, 128>}, {transform_indices = @transform_1, window_bounds = array<i64: 128, 128>}, {transform_indices = @transform_2, window_bounds = array<i64: 1, 128>}, {transform_indices = @transform_3, window_bounds = array<i64: 8, 128>}]} {
    %c0_i32 = arith.constant 0 : i32
    %0 = arith.cmpi eq, %arg2, %c0_i32 : i32
    %1 = arith.extui %0 : i1 to i32
    %c0_i32_0 = arith.constant 0 : i32
    %2 = arith.cmpi ne, %1, %c0_i32_0 : i32
    scf.if %2 {
      %cst_15 = arith.constant 0.000000e+00 : f32
      %18 = vector.broadcast %cst_15 : f32 to vector<8x128xf32>
      %c0_16 = arith.constant 0 : index
      %c0_17 = arith.constant 0 : index
      %19 = vector.load %arg7[%c0_16, %c0_17] : memref<8x128xf32, #tpu.memory_space<vmem>>, vector<8x128xf32>
      tpu.vector_store %arg7[%c0_16, %c0_17], %18 {strides = array<i32>} : memref<8x128xf32, #tpu.memory_space<vmem>>, vector<8x128xf32>,
      %cst_18 = arith.constant 0.000000e+00 : f32
      %20 = vector.broadcast %cst_18 : f32 to vector<8x1xf32>
      %c0_19 = arith.constant 0 : index
      %c0_20 = arith.constant 0 : index
      %21 = vector.load %arg8[%c0_19, %c0_20] : memref<8x1xf32, #tpu.memory_space<vmem>>, vector<8x1xf32>
      tpu.vector_store %arg8[%c0_19, %c0_20], %20 {strides = array<i32>} : memref<8x1xf32, #tpu.memory_space<vmem>>, vector<8x1xf32>,
    } else {
    }
    %c0 = arith.constant 0 : index
    %c0_1 = arith.constant 0 : index
    %3 = vector.load %arg3[%c0, %c0_1] : memref<8x128xf32, #tpu.memory_space<vmem>>, vector<8x128xf32>
    %c0_2 = arith.constant 0 : index
    %c0_3 = arith.constant 0 : index
    %4 = vector.load %arg7[%c0_2, %c0_3] : memref<8x128xf32, #tpu.memory_space<vmem>>, vector<8x128xf32>
    %c0_4 = arith.constant 0 : index
    %c0_5 = arith.constant 0 : index
    %5 = vector.load %arg4[%c0_4, %c0_5] : memref<128x128xf32, #tpu.memory_space<vmem>>, vector<128x128xf32>
    %cst = arith.constant dense<0.000000e+00> : vector<8x128xf32>
    %6 = tpu.matmul %3, %5, %cst {dimension_numbers = #tpu.dot_dimension_numbers<[1], [0], [0], [1], [0, 0, 1, 1], [], []>} : vector<8x128xf32>, vector<128x128xf32>, vector<8x128xf32> -> vector<8x128xf32>
    %7 = arith.addf %4, %6 : vector<8x128xf32>
    %c0_6 = arith.constant 0 : index
    %c0_7 = arith.constant 0 : index
    %8 = vector.load %arg7[%c0_6, %c0_7] : memref<8x128xf32, #tpu.memory_space<vmem>>, vector<8x128xf32>
    tpu.vector_store %arg7[%c0_6, %c0_7], %7 {strides = array<i32>} : memref<8x128xf32, #tpu.memory_space<vmem>>, vector<8x128xf32>,
    %c0_8 = arith.constant 0 : index
    %c0_9 = arith.constant 0 : index
    %9 = vector.load %arg8[%c0_8, %c0_9] : memref<8x1xf32, #tpu.memory_space<vmem>>, vector<8x1xf32>
    %10 = arith.mulf %3, %3 : vector<8x128xf32>
    %cst_10 = arith.constant dense<0.000000e+00> : vector<8xf32>
    %11 = vector.multi_reduction <add>, %10, %cst_10 [1] : vector<8x128xf32> to vector<8xf32>
    %12 = vector.shape_cast %11 : vector<8xf32> to vector<8x1xf32>
    %13 = arith.addf %9, %12 : vector<8x1xf32>
    %c0_11 = arith.constant 0 : index
    %c0_12 = arith.constant 0 : index
    %14 = vector.load %arg8[%c0_11, %c0_12] : memref<8x1xf32, #tpu.memory_space<vmem>>, vector<8x1xf32>
    tpu.vector_store %arg8[%c0_11, %c0_12], %13 {strides = array<i32>} : memref<8x1xf32, #tpu.memory_space<vmem>>, vector<8x1xf32>,
    %c0_i32_13 = arith.constant 0 : i32
    %15 = arith.cmpi eq, %arg2, %c0_i32_13 : i32
    %16 = arith.extui %15 : i1 to i32
    %c0_i32_14 = arith.constant 0 : i32
    %17 = arith.cmpi ne, %16, %c0_i32_14 : i32
    scf.if %17 {
      %c0_15 = arith.constant 0 : index
      %c0_16 = arith.constant 0 : index
      %18 = vector.load %arg8[%c0_15, %c0_16] : memref<8x1xf32, #tpu.memory_space<vmem>>, vector<8x1xf32>
      %cst_17 = arith.constant 1.000000e-24 : f32
      %19 = vector.broadcast %cst_17 : f32 to vector<8x1xf32>
      %20 = arith.maximumf %18, %19 : vector<8x1xf32>
      %21 = math.rsqrt %20 : vector<8x1xf32>
      %c0_18 = arith.constant 0 : index
      %c0_19 = arith.constant 0 : index
      %22 = vector.load %arg7[%c0_18, %c0_19] : memref<8x128xf32, #tpu.memory_space<vmem>>, vector<8x128xf32>
      %23 = vector.broadcast %21 : vector<8x1xf32> to vector<8x128xf32>
      %24 = arith.mulf %23, %22 : vector<8x128xf32>
      %c0_20 = arith.constant 0 : index
      %c0_21 = arith.constant 0 : index
      %25 = vector.load %arg5[%c0_20, %c0_21] : memref<1x128xf32, #tpu.memory_space<vmem>>, vector<1x128xf32>
      %26 = vector.broadcast %25 : vector<1x128xf32> to vector<8x128xf32>
      %27 = arith.mulf %24, %26 : vector<8x128xf32>
      %c0_22 = arith.constant 0 : index
      %c0_23 = arith.constant 0 : index
      %28 = vector.load %arg6[%c0_22, %c0_23] : memref<8x128xf32, #tpu.memory_space<vmem>>, vector<8x128xf32>
      tpu.vector_store %arg6[%c0_22, %c0_23], %27 {strides = array<i32>} : memref<8x128xf32, #tpu.memory_space<vmem>>, vector<8x128xf32>,
    } else {
    }
    return
  }
  func.func @transform_0(%arg0: i32, %arg1: i32, %arg2: i32) -> (i32, i32) {
    %c0_i32 = arith.constant 0 : i32
    return %arg0, %arg2 : i32, i32
  }
  func.func @transform_1(%arg0: i32, %arg1: i32, %arg2: i32) -> (i32, i32) {
    %c0_i32 = arith.constant 0 : i32
    return %arg2, %arg1 : i32, i32
  }
  func.func @transform_2(%arg0: i32, %arg1: i32, %arg2: i32) -> (i32, i32) {
    %c0_i32 = arith.constant 0 : i32
    %c0_i32_0 = arith.constant 0 : i32
    return %c0_i32, %arg1 : i32, i32
  }
  func.func @transform_3(%arg0: i32, %arg1: i32, %arg2: i32) -> (i32, i32) {
    %c0_i32 = arith.constant 0 : i32
    return %arg0, %arg1 : i32, i32
  }
}

</mosaic_0001>

<bundles_post_ra>
// kernel: tpu_custom_call.1
= control target key start
LH: loop header
LB: loop body
LE: loop exit
PB: predicated region body
PF: predicated region fallthrough
CT: control target
= control target key end

     0   :  { %8 = vsyncpa [#allocation5], 0  ;;  %s421_s0 = inlined_call_operand.hbm [shape: f32[8,128], index: 0, kind: input, shape index: {}]   ;;  %s422_s1 = inlined_call_operand.hbm [shape: f32[128,128], index: 1, kind: input, shape index: {}]   ;;  %s423_s2 = inlined_call_operand.vmem [shape: f32[1,128], index: 2, kind: input, shape index: {}]   ;;  %s424_s3 = inlined_call_operand.hbm [shape: f32[8,128], index: 3, kind: output, shape index: {}]  }
   0x1   :  { %9 = vsyncpa [#allocation8], 0 }
   0x2   :  { %10 = vsyncpa [#allocation6], 0  ;;  %s344_s12 = smov [#allocation4]   ;;  %s345_s14 = smov [#allocation7]  }
   0x3   :  { %s17_s13 = sshll.u32 %s344_s12, 4  ;;  %s26_s15 = sshll.u32 %s345_s14, 4  ;;  %s18_s13 = int_to_ptr.vmem [resolvable:$true] %s17_s13  ;;  %s373_s15 = int_to_ptr.vmem [resolvable:$true] %s26_s15 }
   0x4   :  { %s272_s18 = scalar_lea.hbm %s421_s0, 128 }
   0x5   :  { %p273_p0 = scmp.ne.s32.totalorder %s421_s0, %s272_s18  ;;  %p276_p1 = scmp.lt.u32.totalorder %s272_s18, %s421_s0 }
   0x7   :  { %p278_p2 = pnand %p276_p1, %p273_p0 }
   0x9   :  { %281 = shalt.err (!%p278_p2)
}
   0xa   :  { %s282_s23 = scalar_lea.vmem %s18_s13, 128  ;;  %p287_p4 = scmp.lt.s32.totalorder %s18_s13, %s18_s13 }
   0xb   :  { %p283_p3 = scmp.ne.s32.totalorder %s18_s13, %s282_s23  ;;  %p288_p5 = scmp.lt.s32.totalorder %s282_s23, %s282_s23 }
   0xd   :  { %p289_p6 = por %p288_p5, %p287_p4 }
   0xf   :  { %p290_p7 = pnand %p289_p6, %p283_p3 }
  0x11   :  { %293 = shalt.err (!%p290_p7)
}
  0x12   :  { %20 = dma.hbm_to_vmem [thread:$0]  %s421_s0, 128, %s18_s13, [#allocation5]  }
  0x13   :  { %s294_s28 = scalar_lea.hbm %s422_s1, 2048 }
  0x14   :  { %p295_p8 = scmp.ne.s32.totalorder %s422_s1, %s294_s28  ;;  %p298_p9 = scmp.lt.u32.totalorder %s294_s28, %s422_s1 }
  0x16   :  { %p300_p10 = pnand %p298_p9, %p295_p8 }
  0x18   :  { %303 = shalt.err (!%p300_p10)
}
  0x19   :  { %s304_s6 = scalar_lea.vmem %s373_s15, 2048  ;;  %p309_p12 = scmp.lt.s32.totalorder %s373_s15, %s373_s15 }
  0x1a   :  { %p305_p11 = scmp.ne.s32.totalorder %s373_s15, %s304_s6  ;;  %p310_p13 = scmp.lt.s32.totalorder %s304_s6, %s304_s6 }
  0x1c   :  { %p311_p0 = por %p310_p13, %p309_p12 }
  0x1e   :  { %p312_p1 = pnand %p311_p0, %p305_p11 }
  0x20   :  { %315 = shalt.err (!%p312_p1)
}
  0x21   :  { %s346_s0 = smov 128   ;;  %s347_s7 = smov 8  }
  0x22   :  { %32 = dma.hbm_to_vmem [thread:$0]  %s422_s1, 2048, %s373_s15, [#allocation8], %s346_s0, %s346_s0, %s347_s7  }
  0x23   :  { %338 = dma.done.wait [#allocation5], 128  }
  0x24   :  { %339 = vsyncadd [#allocation5], 4294967168 }
  0x25   :  { %340 = dma.done.wait [#allocation8], 2048  }
  0x26   :  { %341 = vsyncadd [#allocation8], 4294965248  ;;  %vm46_vm0 = vcmask 7168   ;;  %v348_v0 = vmov 0.0|0.0   ;;  %v349_v1 = vmov 0.0   ;;  %vm350_vm1 = vmmov 0  }
  0x27   :  { %236 = vmatprep.subr.bf16.mxu0 %v348_v0  ;;  %47 = vst.msk [vmem:[#allocation3] sm:$0xff] %vm46_vm0, %v349_v1  ;;  %233 = vmatprep.mubr.msk.f32.mxu0 %vm350_vm1, %v349_v1  ;;  %v48_v2 = vld [vmem:[#allocation4] sm:$0xff]  ;;  %v50_v3 = vld [vmem:[#allocation7] sm:$0xff]  ;;  %v51_v4 = vld [vmem:[#allocation7 + $0x8] sm:$0xff]  ;;  %v351_v24 = vmov 0   ;;  %s352_s11 = smov [#allocation9]  }
  0x28   :  { %v139_v5 = vmul.f32 %v48_v2, %v48_v2  ;;  %v237_v6 = vpack.c.bf16 %v51_v4, %v50_v3  ;;  %v52_v7 = vld [vmem:[#allocation7 + $0x10] sm:$0xff]  ;;  %v53_v8 = vld [vmem:[#allocation7 + $0x18] sm:$0xff]  ;;  %v54_v10 = vld [vmem:[#allocation7 + $0x20] sm:$0xff]  ;;  %269 = vset.pattern.permute.xlu0 %v351_v24  ;;  %s173_s12 = sshll.u32 %s352_s11, 4  ;;  %s174_s12 = int_to_ptr.vmem [resolvable:$true] %s173_s12 }
  0x29   :  { %v240_v9 = vpack.c.bf16 %v53_v8, %v52_v7  ;;  %v55_v11 = vld [vmem:[#allocation7 + $0x28] sm:$0xff]  ;;  %v56_v13 = vld [vmem:[#allocation7 + $0x30] sm:$0xff]  ;;  %v57_v14 = vld [vmem:[#allocation7 + $0x38] sm:$0xff]  ;;  %s316_s13 = scalar_lea.vmem %s174_s12, 128  ;;  %p321_p3 = scmp.lt.s32.totalorder %s174_s12, %s174_s12 }
  0x2a   :  { %140 = vadd.xlane.f32.xlu0 %v139_v5  ;;  %238 = vmatpush3.bf16.msra.mxu0 %v237_v6  ;;  %v243_v12 = vpack.c.bf16 %v55_v11, %v54_v10  ;;  %v246_v15 = vpack.c.bf16 %v57_v14, %v56_v13  ;;  %v58_v16 = vld [vmem:[#allocation7 + $0x40] sm:$0xff]  ;;  %v59_v17 = vld [vmem:[#allocation7 + $0x48] sm:$0xff]  ;;  %v60_v19 = vld [vmem:[#allocation7 + $0x50] sm:$0xff]  ;;  %p317_p2 = scmp.ne.s32.totalorder %s174_s12, %s316_s13  ;;  %p322_p4 = scmp.lt.s32.totalorder %s316_s13, %s316_s13 }
  0x2b   :  { %239 = vmatprep.subr.bf16.mxu0 %v348_v0  ;;  %v249_v18 = vpack.c.bf16 %v59_v17, %v58_v16  ;;  %v61_v20 = vld [vmem:[#allocation7 + $0x58] sm:$0xff]  ;;  %v62_v22 = vld [vmem:[#allocation7 + $0x60] sm:$0xff]  ;;  %v63_v23 = vld [vmem:[#allocation7 + $0x68] sm:$0xff] }
  0x2c   :  { %v252_v21 = vpack.c.bf16 %v61_v20, %v60_v19  ;;  %v255_v25 = vpack.c.bf16 %v63_v23, %v62_v22  ;;  %v64_v26 = vld [vmem:[#allocation7 + $0x70] sm:$0xff]  ;;  %v65_v27 = vld [vmem:[#allocation7 + $0x78] sm:$0xff]  ;;  %p323_p5 = por %p322_p4, %p321_p3 }
  0x2d   :  { %v258_v28 = vpack.c.bf16 %v65_v27, %v64_v26  ;;  %v183_v37 = vld [vmem:[%s423_s2] ss:$0 sm:$0xff] }
  0x2e   :  { %241 = vmatpush3.bf16.msra.mxu0 %v240_v9  ;;  %v138_v29 = vld [vmem:[#allocation3] sm:$0xff]  ;;  %p324_p6 = pnand %p323_p5, %p317_p2 }
  0x2f   :  { %242 = vmatprep.subr.bf16.mxu0 %v348_v0 }
  0x32   :  { %244 = vmatpush3.bf16.msra.mxu0 %v243_v12 }
  0x33   :  { %245 = vmatprep.subr.bf16.mxu0 %v348_v0 }
  0x36   :  { %247 = vmatpush3.bf16.msra.mxu0 %v246_v15 }
  0x37   :  { %248 = vmatprep.subr.bf16.mxu0 %v348_v0 }
  0x3a   :  { %250 = vmatpush3.bf16.msra.mxu0 %v249_v18 }
  0x3b   :  { %251 = vmatprep.subr.bf16.mxu0 %v348_v0 }
  0x3e   :  { %253 = vmatpush3.bf16.msra.mxu0 %v252_v21 }
  0x3f   :  { %254 = vmatprep.subr.bf16.mxu0 %v348_v0 }
  0x42   :  { %256 = vmatpush3.bf16.msra.mxu0 %v255_v25 }
  0x43   :  { %257 = vmatprep.subr.bf16.mxu0 %v348_v0 }
  0x46   :  { %259 = vmatpush3.bf16.msra.mxu0 %v258_v28 }
  0x49   :  { %234 = vmatmul.mubr.f32.vlgmr.msra.gmra.mrb[0].mxu0 %v48_v2 }
  0xb7   :  { %v141_v30 = vpop.xlane.xlu0 %140 }
  0xb8   :  { %v142_v31 = vadd.f32 %v141_v30, %v138_v29 }
  0xba   :  { %144 = vst.msk [vmem:[#allocation3] sm:$0xff] %vm46_vm0, %v142_v31 }
  0xc1   :  { %v148_v32 = vld [vmem:[#allocation3] sm:$0xff] }
  0xc2   :  { %v149_v33 = vmax.f32 %v148_v32, 1e-24 }
  0xc4   :  { %270 = vrsqrt.f32 %v149_v33 }
  0xce   :  { %v271_v34 = vpop.eup %270 }
  0xcf   :  { %154 = vperm.xlu0 %269, %v271_v34  }
 0x11c   :  { %v132_v35 = vpop.f32.mrb[0].mxu0 }
 0x11d   :  { %v235_v36 = vpop.f32.mrb[1].mxu0 }
 0x14e   :  { %v155_v38 = vpop.permute.xlu0 %154 }
 0x14f   :  { %v157_v39 = vmul.f32 %v155_v38, %v132_v35 }
 0x151   :  { %v165_v40 = vmul.f32 %v183_v37, %v157_v39 }
 0x153   :  { %166 = vst [vmem:[#allocation9] sm:$0xff] %v165_v40 }
 0x154   :  { %327 = shalt.err (!%p324_p6)
}
 0x155   :  { %s328_s16 = scalar_lea.hbm %s424_s3, 128 }
 0x156   :  { %p329_p7 = scmp.ne.s32.totalorder %s424_s3, %s328_s16  ;;  %p332_p8 = scmp.lt.u32.totalorder %s328_s16, %s424_s3 }
 0x158   :  { %p334_p9 = pnand %p332_p8, %p329_p7 }
 0x15a   :  { %337 = shalt.err (!%p334_p9)
}
 0x15b   :  { %176 = dma.vmem_to_hbm [thread:$0]  %s174_s12, 128, %s424_s3, [#allocation6]  }
 0x15c   :  { %342 = dma.done.wait [#allocation6], 128  }
 0x15d   :  { %343 = vsyncadd [#allocation6], 4294967168 }
 0x15e   :  { %180 = vsyncpa [#allocation5], 1 }
 0x15f   :  { %181 = vsyncpa [#allocation8], 1 }
 0x160   :  { %182 = vsyncpa [#allocation6], 1 }

</bundles_post_ra>
